<compile_context>
chip_gen: v5e
topology: v5e:2x2
jax: 0.10.0
libtpu: 0.0.40
codegen_flags: <defaults>
</compile_context>

<pallas_src>
import functools

import jax
import jax.numpy as jnp
import numpy as np
from jax.experimental import pallas as pl
from jax.experimental.pallas import tpu as pltpu


def _round_up(n, m):
    return ((n + m - 1) // m) * m


# ----------------------------------------------------------------------------
# Pallas kernel: fused 3-layer MLP forward for one batch tile (batch on lanes).
# ----------------------------------------------------------------------------
def critic_kernel(xt_ref, w1_ref, b1_ref, w2_ref, b2_ref, w3_ref, b3_ref,
                  o_ref, *, matmul_dtype):
    # layer 1: (H, obs) @ (obs, tb) + (H, 1) -> tanh    (f32 accumulate)
    h1 = jnp.tanh(
        jnp.dot(w1_ref[...], xt_ref[...], preferred_element_type=jnp.float32)
        + b1_ref[...]
    )
    # layer 2: (H, H) @ (H, tb) + (H, 1) -> tanh
    h2 = jnp.tanh(
        jnp.dot(w2_ref[...], h1.astype(matmul_dtype),
                preferred_element_type=jnp.float32)
        + b2_ref[...]
    )
    # value head on the MXU: (1, H) @ (H, tb) -> lane-dense (1, tb) row.
    v = jnp.dot(w3_ref[...], h2, preferred_element_type=jnp.float32) + b3_ref[0, 0]
    o_ref[...] = v.astype(o_ref.dtype)


# ----------------------------------------------------------------------------
# Wrapper: layout plumbing (transpose / one-time casts), tile & grid selection.
# ----------------------------------------------------------------------------
def critic_forward(x, params, *, tile_b=2048, matmul_dtype=jnp.bfloat16):
    """x: (B, obs_dim) float32 -> (B, 1) float32.

    params are in PyTorch layout: w1 (H, obs), b1 (H,), w2 (H, H), b2 (H,),
    w3 (1, H), b3 (1,).
    """
    w1, b1, w2, b2, w3, b3 = params
    B, obs_dim = x.shape
    H = w1.shape[0]
    assert w3.shape[0] == 1, "output dim of critic net can only be 1"

    # Batch-on-lanes input; pre-cast matmul operands once (layout plumbing).
    xt = x.T.astype(matmul_dtype)                    # (obs, B)
    w1k = w1.astype(matmul_dtype)                    # (H, obs)
    w2k = w2.astype(matmul_dtype)                    # (H, H)
    b1c = b1.reshape(H, 1).astype(jnp.float32)       # per-feature bias columns
    b2c = b2.reshape(H, 1).astype(jnp.float32)
    w3r = w3.reshape(1, H).astype(jnp.float32)       # value-head row (f32 head)
    b3s = b3.reshape(1, 1).astype(jnp.float32)       # scalar -> SMEM

    # Tile selection: lane granularity 128; keep grid >= 2 when the batch is
    # big enough so v7x's two TensorCores both get work.
    tb = max(128, min(_round_up(tile_b, 128), _round_up(B, 128)))
    if _round_up(B, 128) >= 256 and pl.cdiv(B, tb) < 2:
        tb = _round_up(pl.cdiv(B, 2), 128)
    nb = pl.cdiv(B, tb)

    kernel = functools.partial(critic_kernel, matmul_dtype=matmul_dtype)
    out = pl.pallas_call(
        kernel,
        out_shape=jax.ShapeDtypeStruct((1, nb * tb), jnp.float32),
        grid=(nb,),
        in_specs=[
            # x^T: tiled along the batch (lanes), pipelined / double-buffered.
            pl.BlockSpec((obs_dim, tb), lambda i: (0, i)),
            # weights & biases: full arrays, resident in VMEM across iterations.
            pl.BlockSpec((H, obs_dim), lambda i: (0, 0)),
            pl.BlockSpec((H, 1), lambda i: (0, 0)),
            pl.BlockSpec((H, H), lambda i: (0, 0)),
            pl.BlockSpec((H, 1), lambda i: (0, 0)),
            pl.BlockSpec((1, H), lambda i: (0, 0)),
            # b3: single scalar in SMEM (no padded VMEM buffer / extra DMA).
            pl.BlockSpec(memory_space=pltpu.MemorySpace.SMEM),
        ],
        out_specs=pl.BlockSpec((1, tb), lambda i: (0, i)),
        compiler_params=pltpu.CompilerParams(
            dimension_semantics=("parallel",)),
    )(xt, w1k, b1c, w2k, b2c, w3r, b3s)

    # Padded / ragged lanes carry garbage-derived values -> slice them off.
    return out[0, :B].reshape(B, 1)


# ----------------------------------------------------------------------------
# Deterministic parameter init mirroring orthogonal_init (orthogonal weight,
# gain sqrt(2), zero bias), stored in PyTorch (out, in) layout.
# ----------------------------------------------------------------------------
def orthogonal(key, out_dim, in_dim, gain):
    rows, cols = out_dim, in_dim
    a = jax.random.normal(key, (max(rows, cols), min(rows, cols)), jnp.float32)
    q, r = jnp.linalg.qr(a)
    q = q * jnp.sign(jnp.diag(r))
    if rows < cols:
        q = q.T
    return gain * q[:rows, :cols]                    # (out, in)


def init_critic_params(key, obs_dim, hidden_dim=128, value_dim=1):
    assert value_dim == 1, "output dim of critic net can only be 1"
    gain = float(np.sqrt(2.0))
    k1, k2, k3 = jax.random.split(key, 3)
    w1 = orthogonal(k1, hidden_dim, obs_dim, gain)       # (H, obs)
    b1 = jnp.zeros((hidden_dim,), jnp.float32)
    w2 = orthogonal(k2, hidden_dim, hidden_dim, gain)    # (H, H)
    b2 = jnp.zeros((hidden_dim,), jnp.float32)
    w3 = orthogonal(k3, value_dim, hidden_dim, gain)     # (1, H)
    b3 = jnp.zeros((value_dim,), jnp.float32)
    return (w1, b1, w2, b2, w3, b3)


# ----------------------------------------------------------------------------
# Pure-JAX reference (high-precision matmuls) for sanity checking.
# ----------------------------------------------------------------------------
def critic_ref(x, params):
    w1, b1, w2, b2, w3, b3 = params
    dot = lambda a, b: jnp.dot(a, b, precision=jax.lax.Precision.HIGHEST)
    h1 = jnp.tanh(dot(x, w1.T) + b1)
    h2 = jnp.tanh(dot(h1, w2.T) + b2)
    return dot(h2, w3.T) + b3


if __name__ == "__main__":
    obs_dim, hidden_dim, value_dim = 32, 128, 1
    key = jax.random.PRNGKey(0)
    kx1, kx2, kp = jax.random.split(key, 3)
    params = init_critic_params(kp, obs_dim, hidden_dim, value_dim)

    # Small batch (not a lane multiple -> single ragged block), f32 matmuls.
    x_small = jax.random.normal(kx1, (10, obs_dim), jnp.float32)
    out_f32 = jax.block_until_ready(
        critic_forward(x_small, params, matmul_dtype=jnp.float32))
    assert out_f32.shape == (10, value_dim)
    np.testing.assert_allclose(np.asarray(out_f32),
                               np.asarray(critic_ref(x_small, params)),
                               rtol=1e-4, atol=1e-4)

    # Larger ragged batch -> 2 grid steps (exercises megacore split + ragged
    # last block) with bf16 matmul operands (f32 accumulation) fast path.
    x_big = jax.random.normal(kx2, (300, obs_dim), jnp.float32)
    out_bf16 = jax.block_until_ready(
        critic_forward(x_big, params, matmul_dtype=jnp.bfloat16))
    assert out_bf16.shape == (300, value_dim)
    np.testing.assert_allclose(np.asarray(out_bf16),
                               np.asarray(critic_ref(x_big, params)),
                               rtol=3e-2, atol=3e-2)

    print("KERNEL_OK")
</pallas_src>

<mosaic_0001>
module attributes {stable_mosaic.version = 11 : i64} {
  func.func @critic_kernel(%arg0: i32, %arg1: memref<32x128xf32, #tpu.memory_space<vmem>>, %arg2: memref<128x32xf32, #tpu.memory_space<vmem>>, %arg3: memref<128x1xf32, #tpu.memory_space<vmem>>, %arg4: memref<128x128xf32, #tpu.memory_space<vmem>>, %arg5: memref<128x1xf32, #tpu.memory_space<vmem>>, %arg6: memref<1x128xf32, #tpu.memory_space<vmem>>, %arg7: memref<1x1xf32, #tpu.memory_space<smem>>, %arg8: memref<1x128xf32, #tpu.memory_space<vmem>>) attributes {dimension_semantics = [#tpu.dimension_semantics<parallel>], iteration_bounds = array<i64: 1>, scalar_prefetch = 0 : i64, scratch_operands = 0 : i64, tpu.core_type = #tpu.core_type<tc>, window_params = [{transform_indices = @transform_0, window_bounds = array<i64: 32, 128>}, {pipeline_mode = #tpu.pipeline_mode<synchronous>, transform_indices = @transform_1, window_bounds = array<i64: 128, 32>}, {pipeline_mode = #tpu.pipeline_mode<synchronous>, transform_indices = @transform_2, window_bounds = array<i64: 128, 1>}, {pipeline_mode = #tpu.pipeline_mode<synchronous>, transform_indices = @transform_3, window_bounds = array<i64: 128, 128>}, {pipeline_mode = #tpu.pipeline_mode<synchronous>, transform_indices = @transform_4, window_bounds = array<i64: 128, 1>}, {pipeline_mode = #tpu.pipeline_mode<synchronous>, transform_indices = @transform_5, window_bounds = array<i64: 1, 128>}, {transform_indices = @transform_6, window_bounds = array<i64: 1, 1>}, {transform_indices = @transform_7, window_bounds = array<i64: 1, 128>}]} {
    %c0 = arith.constant 0 : index
    %c0_0 = arith.constant 0 : index
    %0 = vector.load %arg2[%c0, %c0_0] : memref<128x32xf32, #tpu.memory_space<vmem>>, vector<128x32xf32>
    %c0_1 = arith.constant 0 : index
    %c0_2 = arith.constant 0 : index
    %1 = vector.load %arg1[%c0_1, %c0_2] : memref<32x128xf32, #tpu.memory_space<vmem>>, vector<32x128xf32>
    %cst = arith.constant dense<0.000000e+00> : vector<128x128xf32>
    %2 = tpu.matmul %0, %1, %cst {dimension_numbers = #tpu.dot_dimension_numbers<[1], [0], [0], [1], [0, 0, 1, 1], [], []>} : vector<128x32xf32>, vector<32x128xf32>, vector<128x128xf32> -> vector<128x128xf32>
    %c0_3 = arith.constant 0 : index
    %c0_4 = arith.constant 0 : index
    %3 = vector.load %arg3[%c0_3, %c0_4] : memref<128x1xf32, #tpu.memory_space<vmem>>, vector<128x1xf32>
    %4 = vector.broadcast %3 : vector<128x1xf32> to vector<128x128xf32>
    %5 = arith.addf %2, %4 : vector<128x128xf32>
    %6 = math.tanh %5 : vector<128x128xf32>
    %c0_5 = arith.constant 0 : index
    %c0_6 = arith.constant 0 : index
    %7 = vector.load %arg4[%c0_5, %c0_6] : memref<128x128xf32, #tpu.memory_space<vmem>>, vector<128x128xf32>
    %cst_7 = arith.constant dense<0.000000e+00> : vector<128x128xf32>
    %8 = tpu.matmul %7, %6, %cst_7 {dimension_numbers = #tpu.dot_dimension_numbers<[1], [0], [0], [1], [0, 0, 1, 1], [], []>} : vector<128x128xf32>, vector<128x128xf32>, vector<128x128xf32> -> vector<128x128xf32>
    %c0_8 = arith.constant 0 : index
    %c0_9 = arith.constant 0 : index
    %9 = vector.load %arg5[%c0_8, %c0_9] : memref<128x1xf32, #tpu.memory_space<vmem>>, vector<128x1xf32>
    %10 = vector.broadcast %9 : vector<128x1xf32> to vector<128x128xf32>
    %11 = arith.addf %8, %10 : vector<128x128xf32>
    %12 = math.tanh %11 : vector<128x128xf32>
    %c0_10 = arith.constant 0 : index
    %c0_11 = arith.constant 0 : index
    %13 = vector.load %arg6[%c0_10, %c0_11] : memref<1x128xf32, #tpu.memory_space<vmem>>, vector<1x128xf32>
    %cst_12 = arith.constant dense<0.000000e+00> : vector<1x128xf32>
    %14 = tpu.matmul %13, %12, %cst_12 {dimension_numbers = #tpu.dot_dimension_numbers<[1], [0], [0], [1], [0, 0, 1, 1], [], []>} : vector<1x128xf32>, vector<128x128xf32>, vector<1x128xf32> -> vector<1x128xf32>
    %c0_13 = arith.constant 0 : index
    %c0_14 = arith.constant 0 : index
    %15 = memref.load %arg7[%c0_13, %c0_14] : memref<1x1xf32, #tpu.memory_space<smem>>
    %16 = vector.broadcast %15 : f32 to vector<1x128xf32>
    %17 = arith.addf %14, %16 : vector<1x128xf32>
    %c0_15 = arith.constant 0 : index
    %c0_16 = arith.constant 0 : index
    %18 = vector.load %arg8[%c0_15, %c0_16] : memref<1x128xf32, #tpu.memory_space<vmem>>, vector<1x128xf32>
    tpu.vector_store %arg8[%c0_15, %c0_16], %17 {strides = array<i32>} : memref<1x128xf32, #tpu.memory_space<vmem>>, vector<1x128xf32>,
    return
  }
  func.func @transform_0(%arg0: i32) -> (i32, i32) {
    %c0_i32 = arith.constant 0 : i32
    %c0_i32_0 = arith.constant 0 : i32
    return %c0_i32, %arg0 : i32, i32
  }
  func.func @transform_1(%arg0: i32) -> (i32, i32) {
    %c0_i32 = arith.constant 0 : i32
    %c0_i32_0 = arith.constant 0 : i32
    %c0_i32_1 = arith.constant 0 : i32
    return %c0_i32, %c0_i32_0 : i32, i32
  }
  func.func @transform_2(%arg0: i32) -> (i32, i32) {
    %c0_i32 = arith.constant 0 : i32
    %c0_i32_0 = arith.constant 0 : i32
    %c0_i32_1 = arith.constant 0 : i32
    return %c0_i32, %c0_i32_0 : i32, i32
  }
  func.func @transform_3(%arg0: i32) -> (i32, i32) {
    %c0_i32 = arith.constant 0 : i32
    %c0_i32_0 = arith.constant 0 : i32
    %c0_i32_1 = arith.constant 0 : i32
    return %c0_i32, %c0_i32_0 : i32, i32
  }
  func.func @transform_4(%arg0: i32) -> (i32, i32) {
    %c0_i32 = arith.constant 0 : i32
    %c0_i32_0 = arith.constant 0 : i32
    %c0_i32_1 = arith.constant 0 : i32
    return %c0_i32, %c0_i32_0 : i32, i32
  }
  func.func @transform_5(%arg0: i32) -> (i32, i32) {
    %c0_i32 = arith.constant 0 : i32
    %c0_i32_0 = arith.constant 0 : i32
    %c0_i32_1 = arith.constant 0 : i32
    return %c0_i32, %c0_i32_0 : i32, i32
  }
  func.func @transform_6(%arg0: i32) -> (i32, i32) {
    %c0_i32 = arith.constant 0 : i32
    %c0_i32_0 = arith.constant 0 : i32
    %c0_i32_1 = arith.constant 0 : i32
    return %c0_i32, %c0_i32_0 : i32, i32
  }
  func.func @transform_7(%arg0: i32) -> (i32, i32) {
    %c0_i32 = arith.constant 0 : i32
    %c0_i32_0 = arith.constant 0 : i32
    return %c0_i32, %arg0 : i32, i32
  }
}

</mosaic_0001>

<bundles_post_ra>
// kernel: tpu_custom_call.1
= control target key start
LH: loop header
LB: loop body
LE: loop exit
PB: predicated region body
PF: predicated region fallthrough
CT: control target
= control target key end

     0   :  { %v638_v3 = vmov 0   ;;  %vm144_vm0 = vcmask 261120   ;;  %s930_s0 = inlined_call_operand.vmem [shape: f32[32,10], index: 0, kind: input, shape index: {}]   ;;  %s931_s1 = inlined_call_operand.vmem [shape: f32[128,32], index: 1, kind: input, shape index: {}]   ;;  %s932_s2 = inlined_call_operand.vmem [shape: f32[128,1], index: 2, kind: input, shape index: {}]   ;;  %s933_s3 = inlined_call_operand.vmem [shape: f32[128,128], index: 3, kind: input, shape index: {}]   ;;  %s934_s4 = inlined_call_operand.vmem [shape: f32[128,1], index: 4, kind: input, shape index: {}]   ;;  %s935_s5 = inlined_call_operand.vmem [shape: f32[1,128], index: 5, kind: input, shape index: {}]   ;;  %s936_s6 = inlined_call_operand.<no memory space> [shape: f32[1,1], index: 6, kind: input, shape index: {}]   ;;  %s937_s7 = inlined_call_operand.hbm [shape: f32[1,128], index: 7, kind: output, shape index: {}]  }
   0x1   :  { %v47_v0 = vld [vmem:[%s930_s0 + $0x18] sm:$0xff]  ;;  %v61_v2 = vld [vmem:[%s932_s2 + $0x68] sm:$0xff]  ;;  %546 = vset.pattern.permute.xlu1 %v638_v3  ;;  %545 = vset.pattern.permute.xlu0 %v638_v3  ;;  %v46_v4 = vld [vmem:[%s930_s0 + $0x10] sm:$0xff] }
   0x2   :  { %v63_v1 = vld [vmem:[%s932_s2 + $0x78] sm:$0xff]  ;;  %205 = vmatpush.msra.mxu0 %v47_v0  ;;  %523 = vmatpush.msra.mxu2 %v47_v0  ;;  %v45_v5 = vld [vmem:[%s930_s0 + $0x8] sm:$0xff]  ;;  %v44_v7 = vld [vmem:[%s930_s0] sm:$0xff] }
   0x3   :  { %141 = vperm.xlu0 %545, %v63_v1   ;;  %131 = vperm.xlu1 %546, %v61_v2   ;;  %v59_v6 = vld [vmem:[%s932_s2 + $0x58] sm:$0xff]  ;;  %v28_v8 = vld [vmem:[%s931_s1] sm:$0xff]  ;;  %v38_v9 = vld [vmem:[%s931_s1 + $0x50] sm:$0xff] }
   0x4   :  { %206 = vmatpush.msra.mxu0 %v46_v4  ;;  %524 = vmatpush.msra.mxu2 %v46_v4  ;;  %v62_v10 = vld [vmem:[%s932_s2 + $0x70] sm:$0xff]  ;;  %v60_v11 = vld [vmem:[%s932_s2 + $0x60] sm:$0xff] }
   0x5   :  { %547 = vset.pattern.permute.xlu2 %v638_v3 }
   0x6   :  { %207 = vmatpush.msra.mxu0 %v45_v5  ;;  %525 = vmatpush.msra.mxu2 %v45_v5 }
   0x7   :  { %121 = vperm.xlu2 %547, %v59_v6  }
   0x8   :  { %208 = vmatpush.msra.mxu0 %v44_v7  ;;  %526 = vmatpush.msra.mxu2 %v44_v7 }
   0x9   :  { %507 = vmatmul.msk.f32.vlgmr.msra.gmra.mxu0 %vm144_vm0, %v28_v8  ;;  %517 = vmatmul.msk.f32.vlgmr.msra.gmra.mxu2 %vm144_vm0, %v38_v9 }
   0xa   :  { %13 = vsyncpa [#allocation4], 0  ;;  %v58_v12 = vld [vmem:[%s932_s2 + $0x50] sm:$0xff]  ;;  %v29_v13 = vld [vmem:[%s931_s1 + $0x8] sm:$0xff]  ;;  %s639_s13 = smov [#allocation3]   ;;  %s498_s17 = sshll.u32 %s937_s7, 4  ;;  %s499_s17 = int_to_ptr.hbm [resolvable:$true] %s498_s17 }
   0xb   :  { %136 = vperm.xlu0 %545, %v62_v10   ;;  %126 = vperm.xlu1 %546, %v60_v11   ;;  %v39_v14 = vld [vmem:[%s931_s1 + $0x58] sm:$0xff]  ;;  %v57_v15 = vld [vmem:[%s932_s2 + $0x48] sm:$0xff]  ;;  %v56_v16 = vld [vmem:[%s932_s2 + $0x40] sm:$0xff]  ;;  %s496_s14 = sshll.u32 %s639_s13, 4  ;;  %s497_s14 = int_to_ptr.vmem [resolvable:$true] %s496_s14 }
   0xc   :  { %v55_v17 = vld [vmem:[%s932_s2 + $0x38] sm:$0xff]  ;;  %v30_v18 = vld [vmem:[%s931_s1 + $0x10] sm:$0xff]  ;;  %v40_v19 = vld [vmem:[%s931_s1 + $0x60] sm:$0xff] }
   0xd   :  { %v54_v20 = vld [vmem:[%s932_s2 + $0x30] sm:$0xff]  ;;  %v53_v21 = vld [vmem:[%s932_s2 + $0x28] sm:$0xff]  ;;  %v52_v22 = vld [vmem:[%s932_s2 + $0x20] sm:$0xff] }
   0xe   :  { %v31_v23 = vld [vmem:[%s931_s1 + $0x18] sm:$0xff]  ;;  %v41_v24 = vld [vmem:[%s931_s1 + $0x68] sm:$0xff]  ;;  %v50_v26 = vld [vmem:[%s932_s2 + $0x10] sm:$0xff] }
   0xf   :  { %116 = vperm.xlu2 %547, %v58_v12   ;;  %v51_v25 = vld [vmem:[%s932_s2 + $0x18] sm:$0xff]  ;;  %v49_v27 = vld [vmem:[%s932_s2 + $0x8] sm:$0xff]  ;;  %v32_v28 = vld [vmem:[%s931_s1 + $0x20] sm:$0xff] }
  0x10   :  { %v42_v29 = vld [vmem:[%s931_s1 + $0x70] sm:$0xff]  ;;  %v305_v30 = vld [vmem:[%s934_s4 + $0x78] sm:$0xff]  ;;  %v48_v31 = vld [vmem:[%s932_s2] sm:$0xff] }
  0x11   :  { %508 = vmatmul.msk.f32.gmra.mxu0 %vm144_vm0, %v29_v13  ;;  %518 = vmatmul.msk.f32.gmra.mxu2 %vm144_vm0, %v39_v14  ;;  %v304_v32 = vld [vmem:[%s934_s4 + $0x70] sm:$0xff]  ;;  %v33_v33 = vld [vmem:[%s931_s1 + $0x28] sm:$0xff]  ;;  %v43_v34 = vld [vmem:[%s931_s1 + $0x78] sm:$0xff] }
  0x12   :  { %v302_v35 = vld [vmem:[%s934_s4 + $0x60] sm:$0xff]  ;;  %v303_v36 = vld [vmem:[%s934_s4 + $0x68] sm:$0xff]  ;;  %v301_v37 = vld [vmem:[%s934_s4 + $0x58] sm:$0xff] }
  0x13   :  { %111 = vperm.xlu0 %545, %v57_v15   ;;  %106 = vperm.xlu1 %546, %v56_v16   ;;  %v34_v38 = vld [vmem:[%s931_s1 + $0x30] sm:$0xff]  ;;  %v299_v39 = vld [vmem:[%s934_s4 + $0x48] sm:$0xff]  ;;  %v298_v41 = vld [vmem:[%s934_s4 + $0x40] sm:$0xff] }
  0x14   :  { %v300_v40 = vld [vmem:[%s934_s4 + $0x50] sm:$0xff]  ;;  %v35_v42 = vld [vmem:[%s931_s1 + $0x38] sm:$0xff]  ;;  %v295_v45 = vld [vmem:[%s934_s4 + $0x28] sm:$0xff] }
  0x15   :  { %v296_v43 = vld [vmem:[%s934_s4 + $0x30] sm:$0xff]  ;;  %v297_v44 = vld [vmem:[%s934_s4 + $0x38] sm:$0xff]  ;;  %v36_v46 = vld [vmem:[%s931_s1 + $0x40] sm:$0xff] }
  0x16   :  { %v293_v47 = vld [vmem:[%s934_s4 + $0x18] sm:$0xff]  ;;  %v294_v48 = vld [vmem:[%s934_s4 + $0x20] sm:$0xff]  ;;  %v292_v49 = vld [vmem:[%s934_s4 + $0x10] sm:$0xff] }
  0x17   :  { %101 = vperm.xlu2 %547, %v55_v17   ;;  %v37_v50 = vld [vmem:[%s931_s1 + $0x48] sm:$0xff]  ;;  %v290_v51 = vld [vmem:[%s934_s4] sm:$0xff] }
  0x18   :  { %v291_v52 = vld [vmem:[%s934_s4 + $0x8] sm:$0xff] }
  0x19   :  { %509 = vmatmul.msk.f32.gmra.mxu0 %vm144_vm0, %v30_v18  ;;  %519 = vmatmul.msk.f32.gmra.mxu2 %vm144_vm0, %v40_v19 }
  0x1b   :  { %96 = vperm.xlu0 %545, %v54_v20   ;;  %91 = vperm.xlu1 %546, %v53_v21  }
  0x1f   :  { %86 = vperm.xlu2 %547, %v52_v22  }
  0x21   :  { %510 = vmatmul.msk.f32.gmra.mxu0 %vm144_vm0, %v31_v23  ;;  %520 = vmatmul.msk.f32.gmra.mxu2 %vm144_vm0, %v41_v24 }
  0x23   :  { %81 = vperm.xlu0 %545, %v51_v25   ;;  %76 = vperm.xlu1 %546, %v50_v26  }
  0x27   :  { %71 = vperm.xlu2 %547, %v49_v27  }
  0x29   :  { %511 = vmatmul.msk.f32.gmra.mxu0 %vm144_vm0, %v32_v28  ;;  %521 = vmatmul.msk.f32.gmra.mxu2 %vm144_vm0, %v42_v29 }
  0x2b   :  { %383 = vperm.xlu1 %546, %v305_v30   ;;  %66 = vperm.xlu0 %545, %v48_v31  }
  0x2f   :  { %378 = vperm.xlu2 %547, %v304_v32  }
  0x31   :  { %512 = vmatmul.msk.f32.gmra.mxu0 %vm144_vm0, %v33_v33  ;;  %522 = vmatmul.msk.f32.gmra.mxu2 %vm144_vm0, %v43_v34 }
  0x33   :  { %368 = vperm.xlu1 %546, %v302_v35   ;;  %373 = vperm.xlu0 %545, %v303_v36  }
  0x37   :  { %363 = vperm.xlu2 %547, %v301_v37  }
  0x39   :  { %513 = vmatmul.msk.f32.gmra.mxu0 %vm144_vm0, %v34_v38 }
  0x3b   :  { %353 = vperm.xlu1 %546, %v299_v39   ;;  %358 = vperm.xlu0 %545, %v300_v40  }
  0x3f   :  { %348 = vperm.xlu2 %547, %v298_v41  }
  0x41   :  { %514 = vmatmul.msk.f32.gmra.mxu0 %vm144_vm0, %v35_v42 }
  0x43   :  { %338 = vperm.xlu1 %546, %v296_v43   ;;  %343 = vperm.xlu0 %545, %v297_v44  }
  0x47   :  { %333 = vperm.xlu2 %547, %v295_v45  }
  0x49   :  { %515 = vmatmul.msk.f32.gmra.mxu0 %vm144_vm0, %v36_v46 }
  0x4b   :  { %323 = vperm.xlu1 %546, %v293_v47   ;;  %328 = vperm.xlu0 %545, %v294_v48  }
  0x4f   :  { %318 = vperm.xlu2 %547, %v292_v49  }
  0x51   :  { %516 = vmatmul.msk.f32.gmra.mxu0 %vm144_vm0, %v37_v50 }
  0x53   :  { %308 = vperm.xlu1 %546, %v290_v51   ;;  %313 = vperm.xlu0 %545, %v291_v52   ;;  %v274_v52 = vld [vmem:[%s933_s3] sm:$0xff] }
  0x61   :  { %v122_v3 = vpop.permute.xlu2 %121 }
  0x69   :  { %v117_v13 = vpop.permute.xlu2 %116 }
  0x71   :  { %v102_v22 = vpop.permute.xlu2 %101 }
  0x75   :  { %v142_v62 = vpop.permute.xlu0 %141  ;;  %v132_v0 = vpop.permute.xlu1 %131 }
  0x79   :  { %v87_v30 = vpop.permute.xlu2 %86 }
  0x7d   :  { %v137_v2 = vpop.permute.xlu0 %136  ;;  %v127_v9 = vpop.permute.xlu1 %126 }
  0x81   :  { %v72_v40 = vpop.permute.xlu2 %71 }
  0x85   :  { %v112_v16 = vpop.permute.xlu0 %111  ;;  %v107_v20 = vpop.permute.xlu1 %106 }
  0x86   :  { %v852_v53 = vpop.f32.mrf.mxu0 }
  0x8c   :  { %v240_v54 = vpop.f32.mrf.mxu2 }
  0x8d   :  { %v241_v15 = vadd.f32 %v240_v54, %v117_v13  ;;  %v97_v25 = vpop.permute.xlu0 %96  ;;  %v92_v26 = vpop.permute.xlu1 %91 }
  0x8e   :  { %v854_v55 = vpop.f32.mrf.mxu0 }
  0x8f   :  { %v214_v45 = vadd.f32 %v854_v55, %v72_v40  ;;  %v275_v55 = vld [vmem:[%s933_s3 + $0x8] sm:$0xff] }
  0x94   :  { %v243_v56 = vpop.f32.mrf.mxu2 }
  0x95   :  { %v244_v11 = vadd.f32 %v243_v56, %v122_v3  ;;  %v82_v32 = vpop.permute.xlu0 %81  ;;  %v77_v37 = vpop.permute.xlu1 %76  ;;  %v283_v56 = vld [vmem:[%s933_s3 + $0x48] sm:$0xff]  ;;  %v281_v3 = vld [vmem:[%s933_s3 + $0x38] sm:$0xff] }
  0x96   :  { %v856_v57 = vpop.f32.mrf.mxu0 }
  0x97   :  { %v217_v42 = vadd.f32 %v856_v57, %v77_v37  ;;  %v276_v57 = vld [vmem:[%s933_s3 + $0x10] sm:$0xff] }
  0x9c   :  { %v246_v58 = vpop.f32.mrf.mxu2 }
  0x9d   :  { %v247_v10 = vadd.f32 %v246_v58, %v127_v9  ;;  %v67_v43 = vpop.permute.xlu0 %66  ;;  %v284_v58 = vld [vmem:[%s933_s3 + $0x50] sm:$0xff] }
  0x9e   :  { %v858_v59 = vpop.f32.mrf.mxu0  ;;  %v211_v47 = vadd.f32 %v852_v53, %v67_v43  ;;  %v282_v53 = vld [vmem:[%s933_s3 + $0x40] sm:$0xff] }
  0x9f   :  { %v220_v39 = vadd.f32 %v858_v59, %v82_v32  ;;  %v277_v59 = vld [vmem:[%s933_s3 + $0x18] sm:$0xff] }
  0xa4   :  { %v249_v60 = vpop.f32.mrf.mxu2 }
  0xa5   :  { %v250_v8 = vadd.f32 %v249_v60, %v132_v0  ;;  %v285_v60 = vld [vmem:[%s933_s3 + $0x58] sm:$0xff]  ;;  %v287_v0 = vld [vmem:[%s933_s3 + $0x68] sm:$0xff] }
  0xa6   :  { %v222_v61 = vpop.f32.mrf.mxu0 }
  0xa7   :  { %v223_v36 = vadd.f32 %v222_v61, %v87_v30  ;;  %v278_v61 = vld [vmem:[%s933_s3 + $0x20] sm:$0xff] }
  0xac   :  { %v252_v63 = vpop.f32.mrf.mxu2 }
  0xad   :  { %v253_v4 = vadd.f32 %v252_v63, %v137_v2  ;;  %v279_v63 = vld [vmem:[%s933_s3 + $0x28] sm:$0xff]  ;;  %v288_v2 = vld [vmem:[%s933_s3 + $0x70] sm:$0xff] }
  0xae   :  { %v225_v1 = vpop.f32.mrf.mxu0 }
  0xaf   :  { %548 = vtanh.f32 %v253_v4  ;;  %v226_v34 = vadd.f32 %v225_v1, %v92_v26  ;;  %v280_v1 = vld [vmem:[%s933_s3 + $0x30] sm:$0xff]  ;;  %v289_v4 = vld [vmem:[%s933_s3 + $0x78] sm:$0xff] }
  0xb4   :  { %v255_v5 = vpop.f32.mrf.mxu2 }
  0xb5   :  { %v256_v6 = vadd.f32 %v255_v5, %v142_v62  ;;  %v549_v12 = vpop.eup %548  ;;  %v286_v62 = vld [vmem:[%s933_s3 + $0x60] sm:$0xff] }
  0xb6   :  { %v228_v7 = vpop.f32.mrf.mxu0 }
  0xb7   :  { %550 = vtanh.f32 %v256_v6  ;;  %v229_v33 = vadd.f32 %v228_v7, %v97_v25 }
  0xb8   :  { %552 = vtanh.f32 %v250_v8 }
  0xb9   :  { %554 = vtanh.f32 %v247_v10 }
  0xba   :  { %556 = vtanh.f32 %v244_v11 }
  0xbb   :  { %558 = vtanh.f32 %v241_v15 }
  0xbd   :  { %v551_v14 = vpop.eup %550 }
  0xbe   :  { %v231_v17 = vpop.f32.mrf.mxu0  ;;  %386 = vmatpush.msra.mxu1 %v551_v14  ;;  %527 = vmatpush.msra.mxu3 %v551_v14  ;;  %v553_v18 = vpop.eup %552 }
  0xbf   :  { %v555_v19 = vpop.eup %554  ;;  %v232_v31 = vadd.f32 %v231_v17, %v102_v22  ;;  %v384_v14 = vpop.permute.xlu1 %383 }
  0xc0   :  { %387 = vmatpush.msra.mxu1 %v549_v12  ;;  %528 = vmatpush.msra.mxu3 %v549_v12  ;;  %v557_v21 = vpop.eup %556 }
  0xc1   :  { %v559_v24 = vpop.eup %558 }
  0xc2   :  { %388 = vmatpush.msra.mxu1 %v553_v18  ;;  %529 = vmatpush.msra.mxu3 %v553_v18  ;;  %v374_v18 = vpop.permute.xlu0 %373 }
  0xc4   :  { %389 = vmatpush.msra.mxu1 %v555_v19  ;;  %530 = vmatpush.msra.mxu3 %v555_v19 }
  0xc6   :  { %v234_v23 = vpop.f32.mrf.mxu0  ;;  %390 = vmatpush.msra.mxu1 %v557_v21  ;;  %531 = vmatpush.msra.mxu3 %v557_v21 }
  0xc7   :  { %v235_v28 = vadd.f32 %v234_v23, %v107_v20  ;;  %v369_v19 = vpop.permute.xlu1 %368 }
  0xc8   :  { %391 = vmatpush.msra.mxu1 %v559_v24  ;;  %532 = vmatpush.msra.mxu3 %v559_v24 }
  0xca   :  { %v359_v23 = vpop.permute.xlu0 %358 }
  0xce   :  { %v237_v27 = vpop.f32.mrf.mxu0 }
  0xcf   :  { %v238_v29 = vadd.f32 %v237_v27, %v112_v16  ;;  %v379_v16 = vpop.permute.xlu2 %378  ;;  %v354_v24 = vpop.permute.xlu1 %353 }
  0xd1   :  { %560 = vtanh.f32 %v238_v29 }
  0xd2   :  { %562 = vtanh.f32 %v235_v28  ;;  %v344_v32 = vpop.permute.xlu0 %343 }
  0xd3   :  { %564 = vtanh.f32 %v232_v31 }
  0xd4   :  { %566 = vtanh.f32 %v229_v33 }
  0xd5   :  { %568 = vtanh.f32 %v226_v34 }
  0xd6   :  { %570 = vtanh.f32 %v223_v36 }
  0xd7   :  { %v561_v35 = vpop.eup %560  ;;  %572 = vtanh.f32 %v220_v39  ;;  %v364_v22 = vpop.permute.xlu2 %363 }
  0xd8   :  { %392 = vmatpush.msra.mxu1 %v561_v35  ;;  %533 = vmatpush.msra.mxu3 %v561_v35  ;;  %v563_v38 = vpop.eup %562  ;;  %574 = vtanh.f32 %v217_v42  ;;  %v339_v34 = vpop.permute.xlu1 %338 }
  0xd9   :  { %v565_v41 = vpop.eup %564  ;;  %576 = vtanh.f32 %v214_v45 }
  0xda   :  { %393 = vmatpush.msra.mxu1 %v563_v38  ;;  %534 = vmatpush.msra.mxu3 %v563_v38  ;;  %v567_v44 = vpop.eup %566  ;;  %578 = vtanh.f32 %v211_v47  ;;  %v329_v45 = vpop.permute.xlu0 %328 }
  0xdb   :  { %v569_v46 = vpop.eup %568 }
  0xdc   :  { %394 = vmatpush.msra.mxu1 %v565_v41  ;;  %535 = vmatpush.msra.mxu3 %v565_v41  ;;  %v571_v48 = vpop.eup %570 }
  0xdd   :  { %v573_v49 = vpop.eup %572 }
  0xde   :  { %395 = vmatpush.msra.mxu1 %v567_v44  ;;  %536 = vmatpush.msra.mxu3 %v567_v44  ;;  %v575_v50 = vpop.eup %574 }
  0xdf   :  { %v577_v51 = vpop.eup %576  ;;  %v349_v30 = vpop.permute.xlu2 %348 }
  0xe0   :  { %396 = vmatpush.msra.mxu1 %v569_v46  ;;  %537 = vmatpush.msra.mxu3 %v569_v46  ;;  %v579_v54 = vpop.eup %578 }
  0xe2   :  { %397 = vmatpush.msra.mxu1 %v571_v48  ;;  %538 = vmatpush.msra.mxu3 %v571_v48  ;;  %v324_v48 = vpop.permute.xlu1 %323 }
  0xe4   :  { %398 = vmatpush.msra.mxu1 %v573_v49  ;;  %539 = vmatpush.msra.mxu3 %v573_v49 }
  0xe6   :  { %399 = vmatpush.msra.mxu1 %v575_v50  ;;  %540 = vmatpush.msra.mxu3 %v575_v50 }
  0xe7   :  { %v334_v42 = vpop.permute.xlu2 %333 }
  0xe8   :  { %400 = vmatpush.msra.mxu1 %v577_v51  ;;  %541 = vmatpush.msra.mxu3 %v577_v51 }
  0xea   :  { %401 = vmatpush.msra.mxu1 %v579_v54  ;;  %542 = vmatpush.msra.mxu3 %v579_v54 }
  0xeb   :  { %402 = vmatmul.f32.vlgmr.msra.gmra.mxu1 %v274_v52  ;;  %426 = vmatmul.f32.vlgmr.msra.gmra.mxu3 %v282_v53 }
  0xf3   :  { %405 = vmatmul.f32.gmra.mxu1 %v275_v55  ;;  %429 = vmatmul.f32.gmra.mxu3 %v283_v56  ;;  %v319_v55 = vpop.permute.xlu2 %318 }
  0xfb   :  { %408 = vmatmul.f32.gmra.mxu1 %v276_v57  ;;  %432 = vmatmul.f32.gmra.mxu3 %v284_v58  ;;  %v314_v58 = vpop.permute.xlu0 %313 }
 0x103   :  { %411 = vmatmul.f32.gmra.mxu1 %v277_v59  ;;  %435 = vmatmul.f32.gmra.mxu3 %v285_v60 }
 0x10b   :  { %414 = vmatmul.f32.gmra.mxu1 %v278_v61  ;;  %438 = vmatmul.f32.gmra.mxu3 %v286_v62  ;;  %v309_v61 = vpop.permute.xlu1 %308 }
 0x113   :  { %417 = vmatmul.f32.gmra.mxu1 %v279_v63  ;;  %441 = vmatmul.f32.gmra.mxu3 %v287_v0 }
 0x11b   :  { %420 = vmatmul.f32.gmra.mxu1 %v280_v1  ;;  %444 = vmatmul.f32.gmra.mxu3 %v288_v2 }
 0x123   :  { %423 = vmatmul.f32.gmra.mxu1 %v281_v3  ;;  %447 = vmatmul.f32.gmra.mxu3 %v289_v4  ;;  %v467_v4 = vld [vmem:[%s935_s5] sm:$0x1] }
 0x168   :  { %v912_v5 = vpop.f32.mrf.mxu1 }
 0x169   :  { %v404_v63 = vadd.f32 %v912_v5, %v309_v61  ;;  %v469_v5 = vstv %s936_s6 }
 0x16e   :  { %v427_v6 = vpop.f32.mrf.mxu3 }
 0x16f   :  { %v428_v41 = vadd.f32 %v427_v6, %v349_v30 }
 0x170   :  { %v914_v7 = vpop.f32.mrf.mxu1 }
 0x171   :  { %v407_v60 = vadd.f32 %v914_v7, %v314_v58 }
 0x176   :  { %v430_v8 = vpop.f32.mrf.mxu3 }
 0x177   :  { %v431_v38 = vadd.f32 %v430_v8, %v354_v24 }
 0x178   :  { %v916_v10 = vpop.f32.mrf.mxu1 }
 0x179   :  { %v410_v57 = vadd.f32 %v916_v10, %v319_v55 }
 0x17e   :  { %v433_v9 = vpop.f32.mrf.mxu3 }
 0x17f   :  { %v434_v36 = vadd.f32 %v433_v9, %v359_v23 }
 0x180   :  { %v412_v12 = vpop.f32.mrf.mxu1 }
 0x181   :  { %v413_v54 = vadd.f32 %v412_v12, %v324_v48 }
 0x186   :  { %v436_v11 = vpop.f32.mrf.mxu3 }
 0x187   :  { %v437_v33 = vadd.f32 %v436_v11, %v364_v22 }
 0x188   :  { %v415_v15 = vpop.f32.mrf.mxu1 }
 0x189   :  { %v416_v52 = vadd.f32 %v415_v15, %v329_v45 }
 0x18e   :  { %v439_v13 = vpop.f32.mrf.mxu3 }
 0x18f   :  { %v440_v31 = vadd.f32 %v439_v13, %v369_v19 }
 0x190   :  { %v418_v20 = vpop.f32.mrf.mxu1 }
 0x191   :  { %v419_v50 = vadd.f32 %v418_v20, %v334_v42 }
 0x196   :  { %v442_v17 = vpop.f32.mrf.mxu3 }
 0x197   :  { %v443_v29 = vadd.f32 %v442_v17, %v374_v18 }
 0x198   :  { %v421_v28 = vpop.f32.mrf.mxu1 }
 0x199   :  { %v422_v47 = vadd.f32 %v421_v28, %v339_v34 }
 0x19e   :  { %v445_v21 = vpop.f32.mrf.mxu3 }
 0x19f   :  { %v446_v26 = vadd.f32 %v445_v21, %v379_v16 }
 0x1a0   :  { %v424_v39 = vpop.f32.mrf.mxu1 }
 0x1a1   :  { %v425_v44 = vadd.f32 %v424_v39, %v344_v32 }
 0x1a6   :  { %v448_v25 = vpop.f32.mrf.mxu3 }
 0x1a7   :  { %v449_v27 = vadd.f32 %v448_v25, %v384_v14 }
 0x1a9   :  { %580 = vtanh.f32 %v449_v27 }
 0x1aa   :  { %582 = vtanh.f32 %v446_v26 }
 0x1ab   :  { %584 = vtanh.f32 %v443_v29 }
 0x1ac   :  { %586 = vtanh.f32 %v440_v31 }
 0x1ad   :  { %588 = vtanh.f32 %v437_v33 }
 0x1ae   :  { %590 = vtanh.f32 %v434_v36 }
 0x1af   :  { %v581_v35 = vpop.eup %580  ;;  %592 = vtanh.f32 %v431_v38 }
 0x1b0   :  { %470 = vmatpush.msrb.mxu2 %v581_v35  ;;  %v583_v37 = vpop.eup %582  ;;  %594 = vtanh.f32 %v428_v41 }
 0x1b1   :  { %v585_v40 = vpop.eup %584  ;;  %596 = vtanh.f32 %v425_v44 }
 0x1b2   :  { %471 = vmatpush.msrb.mxu2 %v583_v37  ;;  %v587_v43 = vpop.eup %586  ;;  %598 = vtanh.f32 %v422_v47 }
 0x1b3   :  { %v589_v46 = vpop.eup %588  ;;  %600 = vtanh.f32 %v419_v50 }
 0x1b4   :  { %472 = vmatpush.msrb.mxu2 %v585_v40  ;;  %v591_v49 = vpop.eup %590  ;;  %602 = vtanh.f32 %v416_v52 }
 0x1b5   :  { %v593_v51 = vpop.eup %592  ;;  %604 = vtanh.f32 %v413_v54 }
 0x1b6   :  { %473 = vmatpush.msrb.mxu2 %v587_v43  ;;  %v595_v53 = vpop.eup %594  ;;  %606 = vtanh.f32 %v410_v57 }
 0x1b7   :  { %v597_v56 = vpop.eup %596  ;;  %608 = vtanh.f32 %v407_v60 }
 0x1b8   :  { %474 = vmatpush.msrb.mxu2 %v589_v46  ;;  %v599_v59 = vpop.eup %598  ;;  %610 = vtanh.f32 %v404_v63 }
 0x1b9   :  { %v601_v62 = vpop.eup %600 }
 0x1ba   :  { %475 = vmatpush.msrb.mxu2 %v591_v49  ;;  %v603_v0 = vpop.eup %602 }
 0x1bb   :  { %v605_v1 = vpop.eup %604 }
 0x1bc   :  { %476 = vmatpush.msrb.mxu2 %v593_v51  ;;  %v607_v2 = vpop.eup %606 }
 0x1bd   :  { %v609_v3 = vpop.eup %608 }
 0x1be   :  { %477 = vmatpush.msrb.mxu2 %v595_v53  ;;  %v611_v6 = vpop.eup %610 }
 0x1c0   :  { %478 = vmatpush.msrb.mxu2 %v597_v56 }
 0x1c2   :  { %479 = vmatpush.msrb.mxu2 %v599_v59 }
 0x1c4   :  { %480 = vmatpush.msrb.mxu2 %v601_v62 }
 0x1c6   :  { %481 = vmatpush.msrb.mxu2 %v603_v0 }
 0x1c8   :  { %482 = vmatpush.msrb.mxu2 %v605_v1 }
 0x1ca   :  { %483 = vmatpush.msrb.mxu2 %v607_v2 }
 0x1cc   :  { %484 = vmatpush.msrb.mxu2 %v609_v3 }
 0x1ce   :  { %485 = vmatpush.msrb.mxu2 %v611_v6 }
 0x1cf   :  { %486 = vmatmul.f32.vlgmr.msrb.gmra.mxu2 %v467_v4 }
 0x252   :  { %v487_v7 = vpop.f32.mrf.mxu2 }
 0x253   :  { %v488_v8 = vadd.f32 %v487_v7, %v469_v5 }
 0x255   :  { %490 = vst [vmem:[#allocation3] sm:$0x1] %v488_v8 }
 0x256   :  { %501 = dma.vmem_to_hbm [thread:$0]  %s497_s14, 16, %s499_s17, [#allocation4]  }
 0x257   :  { %636 = dma.done.wait [#allocation4], 16  }
 0x258   :  { %637 = vsyncadd [#allocation4], 4294967280 }
 0x259   :  { %506 = vsyncpa [#allocation4], 1 }

</bundles_post_ra>
